<compile_context>
chip_gen: v7x
topology: tpu7x:2x2x1
jax: 0.10.0
libtpu: 0.0.40
codegen_flags: <defaults>
</compile_context>

<pallas_src>
import functools

import jax
import jax.numpy as jnp
from jax import lax
from jax.experimental import pallas as pl
from jax.experimental.pallas import tpu as pltpu


def _head_kernel(x_ref, wqkv_ref, o_ref, *, head_size: int):
    # x_ref:    (bb, T, C)   compute dtype (f32 or bf16)
    # wqkv_ref: (C, 3H)      compute dtype, pre-transposed + fused [K | Q | V]
    # o_ref:    (bb, T, H)
    H = head_size
    bb, T, C = x_ref.shape
    cdt = x_ref.dtype  # compute dtype for MXU operands

    # --- fused QKV projection: one matmul, f32 accumulation, no transposes ---
    x2d = x_ref[...].reshape(bb * T, C)
    qkv = jnp.dot(x2d, wqkv_ref[...], preferred_element_type=jnp.float32)  # (bb*T, 3H) f32
    qkv = qkv.reshape(bb, T, 3 * H)

    k = qkv[..., 0:H]
    q = qkv[..., H:2 * H] * (H ** -0.5)       # fold the scale into q (O(T*H) work)
    v = qkv[..., 2 * H:3 * H]

    # MXU operands in compute dtype; accumulation stays f32 via preferred_element_type.
    k = k.astype(cdt)
    q = q.astype(cdt)
    v = v.astype(cdt)

    # --- attention logits: K @ Q^T per batch, contracted on H (no explicit .T) ---
    wei = jnp.einsum('bih,bjh->bij', k, q,
                     preferred_element_type=jnp.float32)          # (bb, T, T) f32

    # --- causal mask: keep query index j <= key index i (tril), finite sentinel ---
    row = lax.broadcasted_iota(jnp.int32, (T, T), 0)
    col = lax.broadcasted_iota(jnp.int32, (T, T), 1)
    wei = jnp.where(col <= row, wei, -1e30)

    # --- softmax over last axis (f32 math); normalization deferred past PV ---
    m = jnp.max(wei, axis=-1, keepdims=True)
    p = jnp.exp(wei - m)                                          # unnormalized probs
    denom = jnp.sum(p, axis=-1, keepdims=True)                    # (bb, T, 1)

    # (Dropout is identity -- see TODO above.)

    out = jnp.einsum('bij,bjh->bih', p.astype(cdt), v,
                     preferred_element_type=jnp.float32)          # (bb, T, H) f32
    out = out * pl.reciprocal(denom, approx=True)                 # EUP divide, (T,H) work
    o_ref[...] = out.astype(o_ref.dtype)


def head_forward(x, w_key, w_query, w_value, *, head_size: int,
                 compute_dtype=None, batch_block=None):
    """x: (B, T, C); w_*: (head_size, C) PyTorch-Linear layout. Returns (B, T, head_size).

    compute_dtype: optional (e.g. jnp.bfloat16) dtype for MXU operands; accumulation
                   and softmax remain f32.
    batch_block:   batches processed per grid step (default: all, appropriate for
                   small shapes; must divide B).
    """
    B, T, C = x.shape
    H = head_size
    bb = batch_block if batch_block is not None else B
    assert B % bb == 0, "batch_block must divide B"

    # One-time wrapper-side fusion + pre-transpose: y = x @ [Wk^T | Wq^T | Wv^T].
    w_qkv = jnp.concatenate([w_key, w_query, w_value], axis=0).T   # (C, 3H)

    if compute_dtype is not None:
        x = x.astype(compute_dtype)
        w_qkv = w_qkv.astype(compute_dtype)

    kernel = functools.partial(_head_kernel, head_size=H)

    # NOTE: output last dim is H=16 (<128 lanes) -> masked partial stores. This is
    # inherent to the single-head module; a multi-head layer would fuse heads into
    # one pallas_call for a lane-dense (>=128-wide) output.
    return pl.pallas_call(
        kernel,
        out_shape=jax.ShapeDtypeStruct((B, T, H), x.dtype),
        grid_spec=pltpu.PrefetchScalarGridSpec(
            num_scalar_prefetch=0,
            grid=(B // bb,),
            in_specs=[
                pl.BlockSpec((bb, T, C), lambda b: (b, 0, 0)),   # batch-tile of x
                pl.BlockSpec((C, 3 * H), lambda b: (0, 0)),      # fused weights, replicated
            ],
            out_specs=pl.BlockSpec((bb, T, H), lambda b: (b, 0, 0)),
        ),
        compiler_params=pltpu.CompilerParams(
            dimension_semantics=("parallel",),
        ),
    )(x, w_qkv)


def head_forward_ref(x, w_key, w_query, w_value, *, head_size: int):
    """Pure-JAX reference matching the PyTorch forward (dropout as identity)."""
    k = x @ w_key.T
    q = x @ w_query.T
    v = x @ w_value.T
    wei = k @ jnp.swapaxes(q, -2, -1)
    wei = wei * (head_size ** -0.5)
    T = wei.shape[-1]
    tril = jnp.tril(jnp.ones((T, T), dtype=bool))
    wei = jnp.where(tril, wei, -jnp.inf)
    wei = jax.nn.softmax(wei, axis=-1)
    return wei @ v


if __name__ == "__main__":
    # Small shapes consistent with the module:
    #   embed_size=32, head_size=16, block_size=8 (== T), dropout=0.0
    B, T, C, H = 2, 8, 32, 16

    key = jax.random.PRNGKey(0)
    kx, kk, kq, kv = jax.random.split(key, 4)

    x = jax.random.normal(kx, (B, T, C), dtype=jnp.float32)
    bound = 1.0 / (C ** 0.5)
    w_key = jax.random.uniform(kk, (H, C), minval=-bound, maxval=bound, dtype=jnp.float32)
    w_query = jax.random.uniform(kq, (H, C), minval=-bound, maxval=bound, dtype=jnp.float32)
    w_value = jax.random.uniform(kv, (H, C), minval=-bound, maxval=bound, dtype=jnp.float32)

    ref = head_forward_ref(x, w_key, w_query, w_value, head_size=H)

    # f32 compute path.
    out = head_forward(x, w_key, w_query, w_value, head_size=H)
    out = jax.block_until_ready(out)
    assert out.shape == (B, T, H)
    assert jnp.allclose(out, ref, atol=5e-3, rtol=5e-3), "f32 mismatch vs reference"

    # bf16 MXU path (f32 accumulation / softmax), looser tolerance.
    out_bf16 = head_forward(x, w_key, w_query, w_value, head_size=H,
                            compute_dtype=jnp.bfloat16)
    out_bf16 = jax.block_until_ready(out_bf16)
    assert out_bf16.shape == (B, T, H)
    assert jnp.allclose(out_bf16.astype(jnp.float32), ref, atol=1e-1, rtol=1e-1), \
        "bf16 mismatch vs reference"

    print("KERNEL_OK")
</pallas_src>

<mosaic_0001>
module attributes {stable_mosaic.version = 11 : i64} {
  func.func @_head_kernel(%arg0: i32, %arg1: memref<2x8x32xf32, #tpu.memory_space<vmem>>, %arg2: memref<32x48xf32, #tpu.memory_space<vmem>>, %arg3: memref<2x8x16xf32, #tpu.memory_space<vmem>>) attributes {dimension_semantics = [#tpu.dimension_semantics<parallel>], iteration_bounds = array<i64: 1>, scalar_prefetch = 0 : i64, scratch_operands = 0 : i64, tpu.core_type = #tpu.core_type<tc>, window_params = [{transform_indices = @transform_0, window_bounds = array<i64: 2, 8, 32>}, {pipeline_mode = #tpu.pipeline_mode<synchronous>, transform_indices = @transform_1, window_bounds = array<i64: 32, 48>}, {transform_indices = @transform_2, window_bounds = array<i64: 2, 8, 16>}]} {
    %c0 = arith.constant 0 : index
    %c0_0 = arith.constant 0 : index
    %c0_1 = arith.constant 0 : index
    %0 = vector.load %arg1[%c0, %c0_0, %c0_1] : memref<2x8x32xf32, #tpu.memory_space<vmem>>, vector<2x8x32xf32>
    %1 = vector.shape_cast %0 : vector<2x8x32xf32> to vector<16x32xf32>
    %c0_2 = arith.constant 0 : index
    %c0_3 = arith.constant 0 : index
    %2 = vector.load %arg2[%c0_2, %c0_3] : memref<32x48xf32, #tpu.memory_space<vmem>>, vector<32x48xf32>
    %cst = arith.constant dense<0.000000e+00> : vector<16x48xf32>
    %3 = tpu.matmul %1, %2, %cst {dimension_numbers = #tpu.dot_dimension_numbers<[1], [0], [0], [1], [0, 0, 1, 1], [], []>} : vector<16x32xf32>, vector<32x48xf32>, vector<16x48xf32> -> vector<16x48xf32>
    %4 = vector.shape_cast %3 : vector<16x48xf32> to vector<2x8x48xf32>
    %5 = vector.extract_strided_slice %4 {offsets = [0, 0, 0], sizes = [2, 8, 16], strides = [1, 1, 1]} : vector<2x8x48xf32> to vector<2x8x16xf32>
    %6 = vector.extract_strided_slice %4 {offsets = [0, 0, 16], sizes = [2, 8, 16], strides = [1, 1, 1]} : vector<2x8x48xf32> to vector<2x8x16xf32>
    %cst_4 = arith.constant 2.500000e-01 : f32
    %7 = vector.broadcast %cst_4 : f32 to vector<2x8x16xf32>
    %8 = arith.mulf %6, %7 : vector<2x8x16xf32>
    %9 = vector.extract_strided_slice %4 {offsets = [0, 0, 32], sizes = [2, 8, 16], strides = [1, 1, 1]} : vector<2x8x48xf32> to vector<2x8x16xf32>
    "tpu.trace_start"() <{level = 10 : i32, message = "bih,bjh->bij"}> : () -> ()
    %cst_5 = arith.constant dense<0.000000e+00> : vector<2x8x8xf32>
    %10 = tpu.matmul %5, %8, %cst_5 {dimension_numbers = #tpu.dot_dimension_numbers<[2], [2], [1], [1], [0, 0, 0, 1, 1, 1], [0], [0]>} : vector<2x8x16xf32>, vector<2x8x16xf32>, vector<2x8x8xf32> -> vector<2x8x8xf32>
    "tpu.trace_stop"() : () -> ()
    %11 = tpu.iota {dimensions = array<i32: 0>} : vector<8x8xi32>
    %12 = tpu.iota {dimensions = array<i32: 1>} : vector<8x8xi32>
    %13 = arith.cmpi sle, %12, %11 : vector<8x8xi32>
    %cst_6 = arith.constant -1.000000e+30 : f32
    %14 = vector.shape_cast %13 : vector<8x8xi1> to vector<1x8x8xi1>
    %15 = vector.broadcast %14 : vector<1x8x8xi1> to vector<2x8x8xi1>
    %16 = vector.broadcast %cst_6 : f32 to vector<2x8x8xf32>
    %17 = arith.select %15, %10, %16 : vector<2x8x8xi1>, vector<2x8x8xf32>
    %cst_7 = arith.constant dense<0xFF800000> : vector<2x8xf32>
    %18 = vector.multi_reduction <maximumf>, %17, %cst_7 [2] : vector<2x8x8xf32> to vector<2x8xf32>
    %19 = vector.shape_cast %18 : vector<2x8xf32> to vector<2x8x1xf32>
    %20 = vector.broadcast %19 : vector<2x8x1xf32> to vector<2x8x8xf32>
    %21 = arith.subf %17, %20 : vector<2x8x8xf32>
    %22 = math.exp %21 : vector<2x8x8xf32>
    %cst_8 = arith.constant dense<0.000000e+00> : vector<2x8xf32>
    %23 = vector.multi_reduction <add>, %22, %cst_8 [2] : vector<2x8x8xf32> to vector<2x8xf32>
    %24 = vector.shape_cast %23 : vector<2x8xf32> to vector<2x8x1xf32>
    "tpu.trace_start"() <{level = 10 : i32, message = "bij,bjh->bih"}> : () -> ()
    %cst_9 = arith.constant dense<0.000000e+00> : vector<2x8x16xf32>
    %25 = tpu.matmul %22, %9, %cst_9 {dimension_numbers = #tpu.dot_dimension_numbers<[2], [1], [1], [2], [0, 0, 0, 1, 1, 2], [0], [0]>} : vector<2x8x8xf32>, vector<2x8x16xf32>, vector<2x8x16xf32> -> vector<2x8x16xf32>
    "tpu.trace_stop"() : () -> ()
    %26 = tpu.reciprocal %24 {approx = true} : vector<2x8x1xf32> -> vector<2x8x1xf32>
    %27 = vector.broadcast %26 : vector<2x8x1xf32> to vector<2x8x16xf32>
    %28 = arith.mulf %25, %27 : vector<2x8x16xf32>
    %c0_10 = arith.constant 0 : index
    %c0_11 = arith.constant 0 : index
    %c0_12 = arith.constant 0 : index
    %29 = vector.load %arg3[%c0_10, %c0_11, %c0_12] : memref<2x8x16xf32, #tpu.memory_space<vmem>>, vector<2x8x16xf32>
    tpu.vector_store %arg3[%c0_10, %c0_11, %c0_12], %28 {strides = array<i32>} : memref<2x8x16xf32, #tpu.memory_space<vmem>>, vector<2x8x16xf32>,
    return
  }
  func.func @transform_0(%arg0: i32) -> (i32, i32, i32) {
    %c0_i32 = arith.constant 0 : i32
    %c0_i32_0 = arith.constant 0 : i32
    %c0_i32_1 = arith.constant 0 : i32
    return %arg0, %c0_i32, %c0_i32_0 : i32, i32, i32
  }
  func.func @transform_1(%arg0: i32) -> (i32, i32) {
    %c0_i32 = arith.constant 0 : i32
    %c0_i32_0 = arith.constant 0 : i32
    %c0_i32_1 = arith.constant 0 : i32
    return %c0_i32, %c0_i32_0 : i32, i32
  }
  func.func @transform_2(%arg0: i32) -> (i32, i32, i32) {
    %c0_i32 = arith.constant 0 : i32
    %c0_i32_0 = arith.constant 0 : i32
    %c0_i32_1 = arith.constant 0 : i32
    return %arg0, %c0_i32, %c0_i32_0 : i32, i32, i32
  }
}

</mosaic_0001>

<bundles_post_ra>
// kernel: tpu_custom_call.1
= control target key start
LH: loop header
LB: loop body
LE: loop exit
PB: predicated region body
PF: predicated region fallthrough
CT: control target
= control target key end

     0   :  { %7 = vsyncpa [#allocation3], 0  ;;  %s726_s0 = inlined_call_operand.hbm [shape: f32[2,8,32], index: 0, kind: input, shape index: {}]   ;;  %s727_s1 = inlined_call_operand.hbm [shape: f32[32,48], index: 1, kind: input, shape index: {}]   ;;  %s728_s2 = inlined_call_operand.hbm [shape: f32[2,8,16], index: 2, kind: output, shape index: {}]  }
   0x1   :  { %8 = vsyncpa [#allocation6], 0 }
   0x2   :  { %9 = vsyncpa [#allocation4], 0  ;;  %s641_s9 = smov [#allocation2]   ;;  %s569_s13 = scalar_lea.hbm %s726_s0, 256 }
   0x3   :  { %s15_s10 = sshll.u32 %s641_s9, 4  ;;  %p570_p0 = scmp.ne.s32.totalorder %s726_s0, %s569_s13  ;;  %s16_s10 = int_to_ptr.vmem [resolvable:$true] %s15_s10 }
   0x4   :  { %p573_p1 = scmp.lt.u32.totalorder %s569_s13, %s726_s0 }
   0x6   :  { %p575_p2 = pnand %p573_p1, %p570_p0 }
   0x8   :  { %578 = shalt.err (!%p575_p2)
}
   0x9   :  { %s579_s18 = scalar_lea.vmem %s16_s10, 256  ;;  %p584_p4 = scmp.lt.s32.totalorder %s16_s10, %s16_s10 }
   0xa   :  { %p580_p3 = scmp.ne.s32.totalorder %s16_s10, %s579_s18  ;;  %p585_p5 = scmp.lt.s32.totalorder %s579_s18, %s579_s18 }
   0xc   :  { %p586_p6 = por %p585_p5, %p584_p4 }
   0xe   :  { %p587_p7 = pnand %p586_p6, %p580_p3 }
  0x10   :  { %590 = shalt.err (!%p587_p7)
}
  0x11   :  { %s642_s19 = smov 128   ;;  %s643_s20 = smov 8  }
  0x12   :  { %21 = dma.hbm_to_vmem [thread:$0]  %s726_s0, 256, %s16_s10, [#allocation3], %s642_s19, %s642_s19, %s643_s20  }
  0x13   :  { %s644_s23 = smov [#allocation5]   ;;  %s591_s27 = scalar_lea.hbm %s727_s1, 512 }
  0x14   :  { %s27_s24 = sshll.u32 %s644_s23, 4  ;;  %p592_p8 = scmp.ne.s32.totalorder %s727_s1, %s591_s27  ;;  %s28_s24 = int_to_ptr.vmem [resolvable:$true] %s27_s24 }
  0x15   :  { %p595_p9 = scmp.lt.u32.totalorder %s591_s27, %s727_s1 }
  0x17   :  { %p597_p10 = pnand %p595_p9, %p592_p8 }
  0x19   :  { %600 = shalt.err (!%p597_p10)
}
  0x1a   :  { %s601_s4 = scalar_lea.vmem %s28_s24, 512  ;;  %p606_p12 = scmp.lt.s32.totalorder %s28_s24, %s28_s24 }
  0x1b   :  { %p602_p11 = scmp.ne.s32.totalorder %s28_s24, %s601_s4  ;;  %p607_p13 = scmp.lt.s32.totalorder %s601_s4, %s601_s4 }
  0x1d   :  { %p608_p0 = por %p607_p13, %p606_p12 }
  0x1f   :  { %p609_p1 = pnand %p608_p0, %p602_p11 }
  0x21   :  { %612 = shalt.err (!%p609_p1)
}
  0x22   :  { %33 = dma.hbm_to_vmem [thread:$0]  %s727_s1, 512, %s28_s24, [#allocation6], %s642_s19, %s642_s19, %s643_s20  }
  0x23   :  { %635 = dma.done.wait [#allocation3], 256  }
  0x24   :  { %636 = vsyncadd [#allocation3], 4294967040 }
  0x25   :  { %637 = dma.done.wait [#allocation6], 512  }
  0x26   :  { %638 = vsyncadd [#allocation6], 4294966784  ;;  %vm46_vm0 = vcmask 261120   ;;  %v42_v0 = vld [vmem:[#allocation5] sm:$0xff]  ;;  %v43_v1 = vld [vmem:[#allocation5 + $0x8] sm:$0xff]  ;;  %v645_v8 = vmov 0.0   ;;  %v287_v16 = vlaneseq }
  0x27   :  { %v44_v2 = vld [vmem:[#allocation5 + $0x10] sm:$0xff]  ;;  %v544_v3 = vpack.c.bf16 %v43_v1, %v42_v0  ;;  %v45_v4 = vld [vmem:[#allocation5 + $0x18] sm:$0xff]  ;;  %524 = vmatprep.subr.mxu1 %v645_v8  ;;  %vm646_vm1 = vmmov 0   ;;  %s647_s1 = smov 112   ;;  %s648_s6 = smov 96   ;;  %vm133_vm2 = vcmask 130048  }
  0x28   :  { %v40_v5 = vld [vmem:[#allocation2] sm:$0xff]  ;;  %v548_v6 = vpack.c.bf16 %v45_v4, %v44_v2  ;;  %v41_v7 = vld [vmem:[#allocation2 + $0x8] sm:$0xff]  ;;  %526 = vmatprep.mubr.msk.f32.mxu1 %vm646_vm1, %v645_v8  ;;  %v288_v17 = vshrl.u32 %v287_v16, 7  ;;  %v290_v18 = vand.u32 127, %v287_v16  ;;  %vm296_vm4 = vcmask 64512   ;;  %s649_s7 = smov [#allocation7]  }
  0x29   :  { %521 = vmatprep.mubr.msk.f32.mxu0 %vm46_vm0, %v40_v5  ;;  %545 = vmatprep.subr.bf16.mxu0 %v544_v3  ;;  %s478_s8 = sshll.u32 %s649_s7, 4  ;;  %s479_s8 = int_to_ptr.vmem [resolvable:$true] %s478_s8 }
  0x2a   :  { %547 = vmatpush3.bf16.msra.mxu0 %v544_v3  ;;  %vm291_vm3 = vcmp.le.s32.totalorder %v290_v18, %v288_v17  ;;  %s613_s9 = scalar_lea.vmem %s479_s8, 256  ;;  %p618_p3 = scmp.lt.s32.totalorder %s479_s8, %s479_s8 }
  0x2b   :  { %549 = vmatprep.subr.bf16.mxu0 %v548_v6  ;;  %p614_p2 = scmp.ne.s32.totalorder %s479_s8, %s613_s9  ;;  %p619_p4 = scmp.lt.s32.totalorder %s613_s9, %s613_s9 }
  0x2d   :  { %p620_p5 = por %p619_p4, %p618_p3 }
  0x2e   :  { %551 = vmatpush3.bf16.msra.mxu0 %v548_v6 }
  0x2f   :  { %534 = vmatprep.subr.mxu0 %v645_v8  ;;  %p621_p6 = pnand %p620_p5, %p614_p2 }
  0x31   :  { %522 = vmatmul.mubr.msk.f32.vlgmr.msra.gmra.mrb[0].mxu0 %vm46_vm0, %v41_v7 }
  0x32   :  { %536 = vmatprep.mubr.msk.f32.mxu0 %vm646_vm1, %v645_v8 }
 0x104   :  { %v523_v9 = vpop.f32.mrb[0].mxu0 }
 0x105   :  { %v119_v10 = vpop.f32.mrb[1].mxu0  ;;  %v129_v12 = vmul.f32 0.25, %v523_v9 }
 0x106   :  { %v128_v11 = vmul.f32 0.25, %v119_v10 }
 0x108   :  { %131 = vrot.lane.b32.xlu0 %v128_v11, %s647_s1 }
 0x10c   :  { %210 = vrot.lane.b32.xlu0 %v129_v12, %s647_s1 }
 0x110   :  { %315 = vrot.lane.b32.xlu0 %v119_v10, %s648_s6 }
 0x17a   :  { %v132_v13 = vpop.permute.xlu0 %131 }
 0x17b   :  { %525 = vmatpush3.xpose.msk.msra.mxu1 %vm133_vm2, %v132_v13 }
 0x17c   :  { %529 = vmatprep.subr.mxu1 %v645_v8 }
 0x17e   :  { %527 = vmatmul.mubr.msk.f32.vlgmr.msra.gmra.mrb[0].mxu1 %vm133_vm2, %v119_v10  ;;  %v211_v14 = vpop.permute.xlu0 %210 }
 0x17f   :  { %530 = vmatpush3.xpose.msk.msra.mxu1 %vm133_vm2, %v211_v14  ;;  %531 = vmatprep.mubr.msk.f32.mxu1 %vm646_vm1, %v645_v8 }
 0x180   :  { %539 = vmatprep.subr.mxu1 %v645_v8 }
 0x182   :  { %532 = vmatmul.mubr.msk.f32.vlgmr.msra.gmra.mrb[2].mxu1 %vm133_vm2, %v523_v9  ;;  %v316_v15 = vpop.permute.xlu0 %315 }
 0x183   :  { %535 = vmatpush3.msra.mxu0 %v316_v15  ;;  %541 = vmatprep.mubr.msk.f32.mxu1 %vm646_vm1, %v645_v8 }
 0x251   :  { %v205_v19 = vpop.f32.mrb[0].mxu1 }
 0x252   :  { %v294_v20 = vsel %vm291_vm3, %v205_v19, -1e+30  ;;  %v528_v21 = vpop.f32.mrb[1].mxu1 }
 0x253   :  { %v297_v22 = vsel %vm296_vm4, %v294_v20, -inf }
 0x254   :  { %298 = vmax.xlane.f32.xlu1 %v297_v22 }
 0x255   :  { %v283_v23 = vpop.f32.mrb[2].mxu1 }
 0x256   :  { %v295_v24 = vsel %vm291_vm3, %v283_v23, -1e+30  ;;  %v533_v25 = vpop.f32.mrb[3].mxu1 }
 0x257   :  { %v300_v26 = vsel %vm296_vm4, %v295_v24, -inf }
 0x258   :  { %301 = vmax.xlane.f32.xlu1 %v300_v26 }
 0x269   :  { %391 = vrot.lane.b32.xlu1 %v523_v9, %s648_s6 }
 0x2e1   :  { %v299_v27 = vpop.xlane.xlu1 %298 }
 0x2e2   :  { %v303_v28 = vsub.f32 %v294_v20, %v299_v27 }
 0x2e4   :  { %v305_v29 = vmul.f32 1.442695, %v303_v28 }
 0x2e5   :  { %v302_v30 = vpop.xlane.xlu1 %301 }
 0x2e6   :  { %561 = vpow2.f32 %v305_v29  ;;  %v304_v31 = vsub.f32 %v295_v24, %v302_v30 }
 0x2e8   :  { %v307_v32 = vmul.f32 1.442695, %v304_v31 }
 0x2e9   :  { %v392_v33 = vpop.permute.xlu1 %391 }
 0x2ea   :  { %563 = vpow2.f32 %v307_v32  ;;  %540 = vmatpush3.msra.mxu1 %v392_v33 }
 0x2f0   :  { %v562_v34 = vpop.eup %561 }
 0x2f1   :  { %537 = vmatmul.mubr.msk.f32.vlgmr.msra.gmra.mrb[2].mxu0 %vm296_vm4, %v562_v34  ;;  %v309_v35 = vsel %vm296_vm4, %v562_v34, 0.0 }
 0x2f2   :  { %310 = vadd.xlane.f32.xlu0 %v309_v35 }
 0x2f4   :  { %v564_v36 = vpop.eup %563 }
 0x2f5   :  { %542 = vmatmul.mubr.msk.f32.vlgmr.msra.gmra.mrb[4].mxu1 %vm296_vm4, %v564_v36  ;;  %v312_v37 = vsel %vm296_vm4, %v564_v36, 0.0 }
 0x2f6   :  { %313 = vadd.xlane.f32.xlu1 %v312_v37 }
 0x37f   :  { %v311_v38 = vpop.xlane.xlu0 %310 }
 0x380   :  { %565 = vrcp.f32 %v311_v38 }
 0x383   :  { %v314_v39 = vpop.xlane.xlu1 %313 }
 0x384   :  { %567 = vrcp.f32 %v314_v39 }
 0x38a   :  { %v566_v40 = vpop.eup %565 }
 0x38e   :  { %v568_v44 = vpop.eup %567 }
 0x3c4   :  { %v387_v41 = vpop.f32.mrb[2].mxu0 }
 0x3c5   :  { %v469_v42 = vmul.f32 %v566_v40, %v387_v41  ;;  %v538_v43 = vpop.f32.mrb[3].mxu0 }
 0x3c7   :  { %471 = vst.msk [vmem:[#allocation7] sm:$0xff] %vm133_vm2, %v469_v42 }
 0x3c8   :  { %v463_v45 = vpop.f32.mrb[4].mxu1 }
 0x3c9   :  { %v470_v46 = vmul.f32 %v568_v44, %v463_v45  ;;  %v543_v47 = vpop.f32.mrb[5].mxu1 }
 0x3cb   :  { %472 = vst.msk [vmem:[#allocation7 + $0x8] sm:$0xff] %vm133_vm2, %v470_v46 }
 0x3cc   :  { %624 = shalt.err (!%p621_p6)
}
 0x3cd   :  { %s625_s12 = scalar_lea.hbm %s728_s2, 256 }
 0x3ce   :  { %p626_p7 = scmp.ne.s32.totalorder %s728_s2, %s625_s12  ;;  %p629_p8 = scmp.lt.u32.totalorder %s625_s12, %s728_s2 }
 0x3d0   :  { %p631_p9 = pnand %p629_p8, %p626_p7 }
 0x3d2   :  { %634 = shalt.err (!%p631_p9)
}
 0x3d3   :  { %484 = dma.vmem_to_hbm [thread:$0]  %s479_s8, 256, %s728_s2, [#allocation4], %s642_s19, %s642_s19, %s643_s20  }
 0x3d4   :  { %639 = dma.done.wait [#allocation4], 256  }
 0x3d5   :  { %640 = vsyncadd [#allocation4], 4294967040 }
 0x3d6   :  { %488 = vsyncpa [#allocation3], 1 }
 0x3d7   :  { %489 = vsyncpa [#allocation6], 1 }
 0x3d8   :  { %490 = vsyncpa [#allocation4], 1 }

</bundles_post_ra>
